<compile_context>
chip_gen: v6e
topology: v6e:2x2x1
jax: 0.10.0
libtpu: 0.0.40
codegen_flags: <defaults>
</compile_context>

<pallas_src>
import jax
import jax.numpy as jnp
from jax import lax
from jax.experimental import pallas as pl
from jax.experimental.pallas import tpu as pltpu


def _round_up(x: int, m: int) -> int:
    return ((x + m - 1) // m) * m


def _sigmoid_f32(z):
    # sigmoid(z) = 1 / (1 + exp(-z)); exp + reciprocal land on the EUP slot.
    # approx=True would be ~free but costs ~1e-4 accuracy; keep exact here.
    return pl.reciprocal(1.0 + jnp.exp(-z), approx=False)


def _lr_kernel_single_k(x_ref, w_ref, b_ref, o_ref):
    # Fast path: whole feature dim in one tile. No scratch, no pl.when.
    # x_ref: (tm, F), w_ref: (tn, F), b_ref: (1, tn), o_ref: (tm, tn).
    z = lax.dot_general(
        x_ref[...], w_ref[...],
        dimension_numbers=(((1,), (1,)), ((), ())),
        preferred_element_type=jnp.float32)
    z = z + b_ref[...].astype(jnp.float32)
    o_ref[...] = _sigmoid_f32(z).astype(o_ref.dtype)


def _lr_kernel_multi_k(x_ref, w_ref, b_ref, o_ref, acc_ref):
    # General path: reduction over the F axis (grid axis 2, last).
    # x_ref: (tm, tk), w_ref: (tn, tk), b_ref: (1, tn),
    # o_ref: (tm, tn), acc_ref: (tm, tn) f32 accumulator.
    k = pl.program_id(2)

    @pl.when(k == 0)
    def _():
        acc_ref[...] = jnp.zeros_like(acc_ref)

    # NT matmul on the MXU: contract F axis of x (axis 1) with F axis of W (axis 1).
    acc_ref[...] += lax.dot_general(
        x_ref[...], w_ref[...],
        dimension_numbers=(((1,), (1,)), ((), ())),
        preferred_element_type=jnp.float32)

    @pl.when(k == pl.num_programs(2) - 1)
    def _():
        z = acc_ref[...] + b_ref[...].astype(jnp.float32)
        o_ref[...] = _sigmoid_f32(z).astype(o_ref.dtype)


def lr_forward(x, weight, bias, *, tm=256, tn=256, tk=512):
    """LR.forward: sigmoid(flatten(x) @ W^T + b).

    x:      any shape (B, ...) -> flattened to (B, F) row-major (same as .view(bt, -1))
    weight: (O, F)  PyTorch nn.Linear layout (no transpose copy is made)
    bias:   (O,)
    Default tile sizes (256, 256, 512) fit comfortably in v7x's 64 MiB VMEM with
    double-buffering; they are clamped down automatically for small problems.
    """
    bt = x.shape[0]
    x2 = x.reshape(bt, -1)
    B, F = x2.shape
    O = weight.shape[0]
    out_dtype = x2.dtype

    # Clamp tiles to (padded) problem size; keep sublane/lane alignment.
    tm = min(tm, _round_up(B, 8))
    tn = min(tn, _round_up(O, 128))
    tk = min(tk, _round_up(F, 128))

    B_pad = _round_up(B, tm)
    O_pad = _round_up(O, tn)
    F_pad = _round_up(F, tk)

    if (B_pad, F_pad) != (B, F):
        x2 = jnp.pad(x2, ((0, B_pad - B), (0, F_pad - F)))
    w = weight
    if (O_pad, F_pad) != (O, F):
        w = jnp.pad(w, ((0, O_pad - O), (0, F_pad - F)))
    b2 = bias.reshape(1, O)
    if O_pad != O:
        b2 = jnp.pad(b2, ((0, 0), (0, O_pad - O)))

    n_k = F_pad // tk

    if n_k == 1:
        # --- Fast path: no reduction axis, no scratch accumulator. ---
        grid = (B_pad // tm, O_pad // tn)
        out = pl.pallas_call(
            _lr_kernel_single_k,
            out_shape=jax.ShapeDtypeStruct((B_pad, O_pad), out_dtype),
            grid=grid,
            in_specs=[
                pl.BlockSpec((tm, F_pad), lambda i, j: (i, 0)),   # x tile
                pl.BlockSpec((tn, F_pad), lambda i, j: (j, 0)),   # W tile (O, F) layout
                pl.BlockSpec((1, tn), lambda i, j: (0, j)),       # bias: resident across i
            ],
            out_specs=pl.BlockSpec((tm, tn), lambda i, j: (i, j)),
            compiler_params=pltpu.CompilerParams(
                dimension_semantics=("parallel", "parallel"),
                vmem_limit_bytes=48 << 20,
            ),
        )(x2, w, b2)
    else:
        # --- General path: tiled reduction over F with an f32 accumulator. ---
        grid = (B_pad // tm, O_pad // tn, n_k)
        out = pl.pallas_call(
            _lr_kernel_multi_k,
            out_shape=jax.ShapeDtypeStruct((B_pad, O_pad), out_dtype),
            grid=grid,
            in_specs=[
                pl.BlockSpec((tm, tk), lambda i, j, k: (i, k)),   # x tile
                pl.BlockSpec((tn, tk), lambda i, j, k: (j, k)),   # W tile (O, F) layout
                pl.BlockSpec((1, tn), lambda i, j, k: (0, j)),    # bias: resident across i, k
            ],
            out_specs=pl.BlockSpec((tm, tn), lambda i, j, k: (i, j)),
            scratch_shapes=[pltpu.VMEM((tm, tn), jnp.float32)],
            compiler_params=pltpu.CompilerParams(
                dimension_semantics=("parallel", "parallel", "arbitrary"),
                vmem_limit_bytes=48 << 20,   # headroom below v7x's 64 MiB physical VMEM
            ),
        )(x2, w, b2)

    return out[:B, :O]


if __name__ == "__main__":
    key = jax.random.PRNGKey(0)
    k_x, k_w, k_b, k_x2, k_w2, k_b2 = jax.random.split(key, 6)

    # --- Test 1: small shapes consistent with the module (padding path,
    #             single-K fast path, grid=(1,1)).
    B, C, H, W = 2, 4, 4, 2            # flattened feature dim = 32
    input_dim = C * H * W
    output_dim = 16

    x = jax.random.normal(k_x, (B, C, H, W), dtype=jnp.float32)
    bound = 1.0 / (input_dim ** 0.5)   # mimic nn.Linear default init
    weight = jax.random.uniform(k_w, (output_dim, input_dim),
                                minval=-bound, maxval=bound, dtype=jnp.float32)
    bias = jax.random.uniform(k_b, (output_dim,),
                              minval=-bound, maxval=bound, dtype=jnp.float32)

    out = lr_forward(x, weight, bias)
    jax.block_until_ready(out)
    ref = jax.nn.sigmoid(x.reshape(B, -1) @ weight.T + bias)
    assert out.shape == (B, output_dim)
    assert jnp.allclose(out, ref, atol=1e-4, rtol=1e-4)

    # --- Test 2: still small, but tile overrides exercise the tiled reduction
    #             (grid k = 2) + accumulator init/finalize path.
    B2, C2, H2, W2 = 8, 2, 8, 16       # flattened feature dim = 256
    in2, out2_dim = C2 * H2 * W2, 128
    x_b = jax.random.normal(k_x2, (B2, C2, H2, W2), dtype=jnp.float32)
    bound2 = 1.0 / (in2 ** 0.5)
    w_b = jax.random.uniform(k_w2, (out2_dim, in2),
                             minval=-bound2, maxval=bound2, dtype=jnp.float32)
    b_b = jax.random.uniform(k_b2, (out2_dim,),
                             minval=-bound2, maxval=bound2, dtype=jnp.float32)

    out_b = lr_forward(x_b, w_b, b_b, tm=8, tn=128, tk=128)   # grid = (1, 1, 2)
    jax.block_until_ready(out_b)
    ref_b = jax.nn.sigmoid(x_b.reshape(B2, -1) @ w_b.T + b_b)
    assert out_b.shape == (B2, out2_dim)
    assert jnp.allclose(out_b, ref_b, atol=1e-4, rtol=1e-4)

    print("KERNEL_OK")
</pallas_src>

<mosaic_0001>
module attributes {stable_mosaic.version = 11 : i64} {
  func.func @_lr_kernel_single_k(%arg0: i32, %arg1: i32, %arg2: memref<8x128xf32, #tpu.memory_space<vmem>>, %arg3: memref<128x128xf32, #tpu.memory_space<vmem>>, %arg4: memref<1x128xf32, #tpu.memory_space<vmem>>, %arg5: memref<8x128xf32, #tpu.memory_space<vmem>>) attributes {dimension_semantics = [#tpu.dimension_semantics<parallel>, #tpu.dimension_semantics<parallel>], iteration_bounds = array<i64: 1, 1>, scalar_prefetch = 0 : i64, scratch_operands = 0 : i64, tpu.core_type = #tpu.core_type<tc>, window_params = [{transform_indices = @transform_0, window_bounds = array<i64: 8, 128>}, {transform_indices = @transform_1, window_bounds = array<i64: 128, 128>}, {transform_indices = @transform_2, window_bounds = array<i64: 1, 128>}, {transform_indices = @transform_3, window_bounds = array<i64: 8, 128>}]} {
    %c0 = arith.constant 0 : index
    %c0_0 = arith.constant 0 : index
    %0 = vector.load %arg2[%c0, %c0_0] : memref<8x128xf32, #tpu.memory_space<vmem>>, vector<8x128xf32>
    %c0_1 = arith.constant 0 : index
    %c0_2 = arith.constant 0 : index
    %1 = vector.load %arg3[%c0_1, %c0_2] : memref<128x128xf32, #tpu.memory_space<vmem>>, vector<128x128xf32>
    %cst = arith.constant dense<0.000000e+00> : vector<8x128xf32>
    %2 = tpu.matmul %0, %1, %cst {dimension_numbers = #tpu.dot_dimension_numbers<[1], [1], [0], [0], [0, 0, 1, 0], [], []>} : vector<8x128xf32>, vector<128x128xf32>, vector<8x128xf32> -> vector<8x128xf32>
    %c0_3 = arith.constant 0 : index
    %c0_4 = arith.constant 0 : index
    %3 = vector.load %arg4[%c0_3, %c0_4] : memref<1x128xf32, #tpu.memory_space<vmem>>, vector<1x128xf32>
    %4 = vector.broadcast %3 : vector<1x128xf32> to vector<8x128xf32>
    %5 = arith.addf %2, %4 : vector<8x128xf32>
    %cst_5 = arith.constant 0.000000e+00 : f32
    %6 = vector.broadcast %cst_5 : f32 to vector<8x128xf32>
    %7 = arith.subf %6, %5 : vector<8x128xf32>
    %8 = math.exp %7 : vector<8x128xf32>
    %cst_6 = arith.constant 1.000000e+00 : f32
    %9 = vector.broadcast %cst_6 : f32 to vector<8x128xf32>
    %10 = arith.addf %9, %8 : vector<8x128xf32>
    %11 = tpu.reciprocal %10 : vector<8x128xf32> -> vector<8x128xf32>
    %c0_7 = arith.constant 0 : index
    %c0_8 = arith.constant 0 : index
    %12 = vector.load %arg5[%c0_7, %c0_8] : memref<8x128xf32, #tpu.memory_space<vmem>>, vector<8x128xf32>
    tpu.vector_store %arg5[%c0_7, %c0_8], %11 {strides = array<i32>} : memref<8x128xf32, #tpu.memory_space<vmem>>, vector<8x128xf32>,
    return
  }
  func.func @transform_0(%arg0: i32, %arg1: i32) -> (i32, i32) {
    %c0_i32 = arith.constant 0 : i32
    %c0_i32_0 = arith.constant 0 : i32
    return %arg0, %c0_i32 : i32, i32
  }
  func.func @transform_1(%arg0: i32, %arg1: i32) -> (i32, i32) {
    %c0_i32 = arith.constant 0 : i32
    %c0_i32_0 = arith.constant 0 : i32
    return %arg1, %c0_i32 : i32, i32
  }
  func.func @transform_2(%arg0: i32, %arg1: i32) -> (i32, i32) {
    %c0_i32 = arith.constant 0 : i32
    %c0_i32_0 = arith.constant 0 : i32
    return %c0_i32, %arg1 : i32, i32
  }
  func.func @transform_3(%arg0: i32, %arg1: i32) -> (i32, i32) {
    %c0_i32 = arith.constant 0 : i32
    return %arg0, %arg1 : i32, i32
  }
}

</mosaic_0001>

<bundles_post_ra>
// kernel: tpu_custom_call.1
= control target key start
LH: loop header
LB: loop body
LE: loop exit
PB: predicated region body
PF: predicated region fallthrough
CT: control target
= control target key end

     0   :  { %8 = vsyncpa [#allocation3], 0  ;;  %s326_s0 = inlined_call_operand.hbm [shape: f32[8,128], index: 0, kind: input, shape index: {}]   ;;  %s327_s1 = inlined_call_operand.hbm [shape: f32[128,128], index: 1, kind: input, shape index: {}]   ;;  %s328_s2 = inlined_call_operand.vmem [shape: f32[1,128], index: 2, kind: input, shape index: {}]   ;;  %s329_s3 = inlined_call_operand.hbm [shape: f32[8,128], index: 3, kind: output, shape index: {}]  }
   0x1   :  { %9 = vsyncpa [#allocation6], 0 }
   0x2   :  { %10 = vsyncpa [#allocation4], 0  ;;  %s287_s12 = smov [#allocation2]   ;;  %s288_s14 = smov [#allocation5]  }
   0x3   :  { %s17_s13 = sshll.u32 %s287_s12, 4  ;;  %s26_s15 = sshll.u32 %s288_s14, 4  ;;  %s18_s13 = int_to_ptr.vmem [resolvable:$true] %s17_s13  ;;  %s27_s15 = int_to_ptr.vmem [resolvable:$true] %s26_s15 }
   0x4   :  { %s229_s16 = scalar_lea.vmem %s18_s13, 128  ;;  %p234_p1 = scmp.lt.s32.totalorder %s18_s13, %s18_s13 }
   0x5   :  { %p230_p0 = scmp.ne.s32.totalorder %s18_s13, %s229_s16  ;;  %p235_p2 = scmp.lt.s32.totalorder %s229_s16, %s229_s16 }
   0x7   :  { %p236_p3 = por %p235_p2, %p234_p1 }
   0x9   :  { %p237_p4 = pnand %p236_p3, %p230_p0 }
   0xb   :  { %240 = shalt.err (!%p237_p4)
}
   0xc   :  { %20 = dma.hbm_to_vmem [thread:$0]  %s326_s0, 128, %s18_s13, [#allocation3]  }
   0xd   :  { %s249_s19 = scalar_lea.vmem %s27_s15, 2048  ;;  %p254_p6 = scmp.lt.s32.totalorder %s27_s15, %s27_s15 }
   0xe   :  { %p250_p5 = scmp.ne.s32.totalorder %s27_s15, %s249_s19  ;;  %p255_p7 = scmp.lt.s32.totalorder %s249_s19, %s249_s19 }
  0x10   :  { %p256_p8 = por %p255_p7, %p254_p6 }
  0x12   :  { %p257_p9 = pnand %p256_p8, %p250_p5 }
  0x14   :  { %260 = shalt.err (!%p257_p9)
}
  0x15   :  { %s289_s20 = smov 128   ;;  %s290_s21 = smov 8  }
  0x16   :  { %32 = dma.hbm_to_vmem [thread:$0]  %s327_s1, 2048, %s27_s15, [#allocation6], %s289_s20, %s289_s20, %s290_s21  }
  0x17   :  { %281 = dma.done.wait [#allocation3], 128  }
  0x18   :  { %282 = vsyncadd [#allocation3], 4294967168 }
  0x19   :  { %283 = dma.done.wait [#allocation6], 2048  }
  0x1a   :  { %284 = vsyncadd [#allocation6], 4294965248  ;;  %v291_v0 = vmov 0.0   ;;  %vm292_vm0 = vmmov 0   ;;  %v57_v1 = vld [vmem:[#allocation5 + $0x78] sm:$0xff]  ;;  %v56_v2 = vld [vmem:[#allocation5 + $0x70] sm:$0xff] }
  0x1b   :  { %175 = vmatprep.subr.mxu0 %v291_v0  ;;  %207 = vmatprep.mubr.msk.f32.mxu0 %vm292_vm0, %v291_v0  ;;  %v55_v3 = vld [vmem:[#allocation5 + $0x68] sm:$0xff]  ;;  %v54_v4 = vld [vmem:[#allocation5 + $0x60] sm:$0xff]  ;;  %v53_v5 = vld [vmem:[#allocation5 + $0x58] sm:$0xff]  ;;  %s293_s24 = smov [#allocation7]  }
  0x1c   :  { %176 = vmatpush3.xpose.msra.mxu0 %v57_v1  ;;  %v52_v6 = vld [vmem:[#allocation5 + $0x50] sm:$0xff]  ;;  %v51_v7 = vld [vmem:[#allocation5 + $0x48] sm:$0xff]  ;;  %v50_v8 = vld [vmem:[#allocation5 + $0x40] sm:$0xff]  ;;  %s147_s25 = sshll.u32 %s293_s24, 4  ;;  %s148_s25 = int_to_ptr.vmem [resolvable:$true] %s147_s25 }
  0x1d   :  { %177 = vmatprep.subr.mxu0 %v291_v0  ;;  %v49_v9 = vld [vmem:[#allocation5 + $0x38] sm:$0xff]  ;;  %v48_v10 = vld [vmem:[#allocation5 + $0x30] sm:$0xff]  ;;  %v47_v11 = vld [vmem:[#allocation5 + $0x28] sm:$0xff]  ;;  %s261_s26 = scalar_lea.vmem %s148_s25, 128  ;;  %p266_p11 = scmp.lt.s32.totalorder %s148_s25, %s148_s25 }
  0x1e   :  { %v46_v12 = vld [vmem:[#allocation5 + $0x20] sm:$0xff]  ;;  %v45_v13 = vld [vmem:[#allocation5 + $0x18] sm:$0xff]  ;;  %v44_v14 = vld [vmem:[#allocation5 + $0x10] sm:$0xff]  ;;  %p262_p10 = scmp.ne.s32.totalorder %s148_s25, %s261_s26  ;;  %p267_p12 = scmp.lt.s32.totalorder %s261_s26, %s261_s26 }
  0x1f   :  { %v43_v15 = vld [vmem:[#allocation5 + $0x8] sm:$0xff]  ;;  %v42_v16 = vld [vmem:[#allocation5] sm:$0xff]  ;;  %v41_v17 = vld [vmem:[#allocation2] sm:$0xff] }
  0x20   :  { %178 = vmatpush3.xpose.msra.mxu0 %v56_v2  ;;  %v157_v18 = vld [vmem:[%s328_s2] ss:$0 sm:$0xff]  ;;  %p268_p13 = por %p267_p12, %p266_p11 }
  0x21   :  { %179 = vmatprep.subr.mxu0 %v291_v0 }
  0x22   :  { %p269_p0 = pnand %p268_p13, %p262_p10 }
  0x24   :  { %180 = vmatpush3.xpose.msra.mxu0 %v55_v3 }
  0x25   :  { %181 = vmatprep.subr.mxu0 %v291_v0 }
  0x28   :  { %182 = vmatpush3.xpose.msra.mxu0 %v54_v4 }
  0x29   :  { %183 = vmatprep.subr.mxu0 %v291_v0 }
  0x2c   :  { %184 = vmatpush3.xpose.msra.mxu0 %v53_v5 }
  0x2d   :  { %185 = vmatprep.subr.mxu0 %v291_v0 }
  0x30   :  { %186 = vmatpush3.xpose.msra.mxu0 %v52_v6 }
  0x31   :  { %187 = vmatprep.subr.mxu0 %v291_v0 }
  0x34   :  { %188 = vmatpush3.xpose.msra.mxu0 %v51_v7 }
  0x35   :  { %189 = vmatprep.subr.mxu0 %v291_v0 }
  0x38   :  { %190 = vmatpush3.xpose.msra.mxu0 %v50_v8 }
  0x39   :  { %191 = vmatprep.subr.mxu0 %v291_v0 }
  0x3c   :  { %192 = vmatpush3.xpose.msra.mxu0 %v49_v9 }
  0x3d   :  { %193 = vmatprep.subr.mxu0 %v291_v0 }
  0x40   :  { %194 = vmatpush3.xpose.msra.mxu0 %v48_v10 }
  0x41   :  { %195 = vmatprep.subr.mxu0 %v291_v0 }
  0x44   :  { %196 = vmatpush3.xpose.msra.mxu0 %v47_v11 }
  0x45   :  { %197 = vmatprep.subr.mxu0 %v291_v0 }
  0x48   :  { %198 = vmatpush3.xpose.msra.mxu0 %v46_v12 }
  0x49   :  { %199 = vmatprep.subr.mxu0 %v291_v0 }
  0x4c   :  { %200 = vmatpush3.xpose.msra.mxu0 %v45_v13 }
  0x4d   :  { %201 = vmatprep.subr.mxu0 %v291_v0 }
  0x50   :  { %202 = vmatpush3.xpose.msra.mxu0 %v44_v14 }
  0x51   :  { %203 = vmatprep.subr.mxu0 %v291_v0 }
  0x54   :  { %204 = vmatpush3.xpose.msra.mxu0 %v43_v15 }
  0x55   :  { %205 = vmatprep.subr.mxu0 %v291_v0 }
  0x58   :  { %206 = vmatpush3.xpose.msra.mxu0 %v42_v16 }
  0x5b   :  { %208 = vmatmul.mubr.f32.vlgmr.msra.gmra.mxu0 %v41_v17 }
 0x11b   :  { %v131_v19 = vpop.f32.mrf.mxu0 }
 0x11c   :  { %v132_v20 = vadd.f32 %v157_v18, %v131_v19 }
 0x11d   :  { %v209_v21 = vpop.f32.mrf.mxu0 }
 0x11e   :  { %v135_v22 = vsub.f32 0.0, %v132_v20 }
 0x120   :  { %v136_v23 = vmul.f32 1.442695, %v135_v22 }
 0x122   :  { %217 = vpow2.f32 %v136_v23 }
 0x12f   :  { %v218_v24 = vpop.eup %217 }
 0x130   :  { %v138_v25 = vadd.f32 1.0, %v218_v24 }
 0x132   :  { %219 = vrcp.f32 %v138_v25 }
 0x13f   :  { %v220_v26 = vpop.eup %219 }
 0x140   :  { %140 = vst [vmem:[#allocation7] sm:$0xff] %v220_v26 }
 0x141   :  { %272 = shalt.err (!%p269_p0)
}
 0x142   :  { %150 = dma.vmem_to_hbm [thread:$0]  %s148_s25, 128, %s329_s3, [#allocation4]  }
 0x143   :  { %285 = dma.done.wait [#allocation4], 128  }
 0x144   :  { %286 = vsyncadd [#allocation4], 4294967168 }
 0x145   :  { %154 = vsyncpa [#allocation3], 1 }
 0x146   :  { %155 = vsyncpa [#allocation6], 1 }
 0x147   :  { %156 = vsyncpa [#allocation4], 1 }

</bundles_post_ra>
